<compile_context>
chip_gen: v6e
topology: v6e:2x2x1
jax: 0.10.0
libtpu: 0.0.40
codegen_flags: <defaults>
</compile_context>

<pallas_src>
import numpy as np
import jax
import jax.numpy as jnp
from jax import lax
from jax.experimental import pallas as pl
from jax.experimental.pallas import tpu as pltpu

LANE = 128  # pad vertex/face axes to this multiple


def _round_up(x, m):
    return ((x + m - 1) // m) * m


# ----------------------------------------------------------------------------
# Host-side mesh construction (deterministic, synthetic "buffers")
# ----------------------------------------------------------------------------
def get_ico_faces(subdivisions: int) -> np.ndarray:
    t = (1.0 + np.sqrt(5.0)) / 2.0
    verts = np.array(
        [[-1, t, 0], [1, t, 0], [-1, -t, 0], [1, -t, 0],
         [0, -1, t], [0, 1, t], [0, -1, -t], [0, 1, -t],
         [t, 0, -1], [t, 0, 1], [-t, 0, -1], [-t, 0, 1]], dtype=np.float64)
    verts /= np.linalg.norm(verts, axis=1, keepdims=True)
    faces = np.array(
        [[0, 11, 5], [0, 5, 1], [0, 1, 7], [0, 7, 10], [0, 10, 11],
         [1, 5, 9], [5, 11, 4], [11, 10, 2], [10, 7, 6], [7, 1, 8],
         [3, 9, 4], [3, 4, 2], [3, 2, 6], [3, 6, 8], [3, 8, 9],
         [4, 9, 5], [2, 4, 11], [6, 2, 10], [8, 6, 7], [9, 8, 1]],
        dtype=np.int64)
    for _ in range(subdivisions):
        verts_list = [v for v in verts]
        cache = {}

        def midpoint(a, b):
            key = (min(a, b), max(a, b))
            if key in cache:
                return cache[key]
            m = (verts_list[a] + verts_list[b]) / 2.0
            m = m / np.linalg.norm(m)
            verts_list.append(m)
            cache[key] = len(verts_list) - 1
            return cache[key]

        new_faces = []
        for a, b, c in faces:
            ab, bc, ca = midpoint(a, b), midpoint(b, c), midpoint(c, a)
            new_faces += [[a, ab, ca], [b, bc, ab], [c, ca, bc], [ab, bc, ca]]
        verts = np.array(verts_list)
        faces = np.array(new_faces, dtype=np.int64)
    return faces


def build_mesh(subdivisions: int):
    faces = get_ico_faces(subdivisions)
    base_height = 2 ** subdivisions
    H, W = 5 * base_height, 2 * base_height
    N = H * W + 2
    F = faces.shape[0]
    assert int(faces.max()) + 1 == N, (faces.max() + 1, N)
    Np = _round_up(N, LANE)
    Fp = _round_up(F, LANE)

    ar = np.arange(F)
    # Edge matrices E1 = S1 - S0, E2 = S2 - S0   (F, N), values in {0, +1, -1}
    E1 = np.zeros((F, N), np.float32)
    E2 = np.zeros((F, N), np.float32)
    E1[ar, faces[:, 1]] += 1.0
    E1[ar, faces[:, 0]] -= 1.0
    E2[ar, faces[:, 2]] += 1.0
    E2[ar, faces[:, 0]] -= 1.0
    # Vertex <- face incidence (N, F)
    INC = np.zeros((N, F), np.float32)
    for c in range(3):
        INC[faces[:, c], ar] = 1.0
    # 0/1 adjacency (symmetric) and inverse degree
    A = np.zeros((N, N), np.float32)
    for a, b, c in faces:
        A[a, b] = A[b, a] = 1.0
        A[b, c] = A[c, b] = 1.0
        A[c, a] = A[a, c] = 1.0
    deg = A.sum(axis=1)
    inv_deg = np.zeros((1, Np), np.float32)
    inv_deg[0, :N] = 1.0 / np.maximum(deg, 1.0)
    ADJ = A / np.maximum(deg[:, None], 1.0)

    # Pre-transposed, zero-padded operators for the lane-dense kernel layout.
    # Fused edge operator: columns [0:Fp] = E1^T, [Fp:2Fp] = E2^T.
    E12T = np.zeros((Np, 2 * Fp), np.float32)
    E12T[:N, :F] = E1.T
    E12T[:N, Fp:Fp + F] = E2.T
    INCT = np.zeros((Fp, Np), np.float32)
    INCT[:F, :N] = INC.T
    AT = np.zeros((Np, Np), np.float32)
    AT[:N, :N] = A.T            # A is symmetric; stored explicitly transposed

    return dict(
        base_height=base_height, H=H, W=W, N=N, F=F, N_pad=Np, F_pad=Fp,
        # kernel operands (bf16 for the exact 0/±1 matrices, f32 inv-degree)
        E12T=jnp.asarray(E12T).astype(jnp.bfloat16),
        INCT=jnp.asarray(INCT).astype(jnp.bfloat16),
        AT=jnp.asarray(AT).astype(jnp.bfloat16),
        INV_DEG=jnp.asarray(inv_deg),
        # f32 unpadded copies for the pure-JAX reference
        E1_f32=jnp.asarray(E1), E2_f32=jnp.asarray(E2),
        INC_f32=jnp.asarray(INC), ADJ_f32=jnp.asarray(ADJ))


# ----------------------------------------------------------------------------
# Pallas kernel: batch-tiled geometry + lane-dense per-vertex loss partial sums
# ----------------------------------------------------------------------------
def p2p_loss_kernel(v_ref, tv_ref, tn_ref, tl_ref, invdeg_ref,
                    e12t_hbm, inct_hbm, at_hbm,
                    out_ref,
                    e12t, inct, at, sems):
    i = pl.program_id(0)
    T = v_ref.shape[0] // 3           # batch elements per grid step
    Fp = e12t.shape[1] // 2           # padded face count

    # ---- one-time mesh-operator DMA: start everything, wait lazily ---------
    @pl.when(i == 0)
    def _start_mesh_dma():
        pltpu.make_async_copy(e12t_hbm, e12t, sems.at[0]).start()
        pltpu.make_async_copy(inct_hbm, inct, sems.at[1]).start()
        pltpu.make_async_copy(at_hbm, at, sems.at[2]).start()
        out_ref[...] = jnp.zeros_like(out_ref)

    v = v_ref[...]                    # (3T, Np) f32, channel-major rows
    tv = tv_ref[...]                  # (3T, Np)
    tn = tn_ref[...]                  # (3T, Np)
    tl = tl_ref[...]                  # (3T, Np)
    inv_deg = invdeg_ref[...]         # (1, Np)
    vb = v.astype(jnp.bfloat16)

    # ---- face edges: one fused MXU matmul  v @ [E1^T | E2^T] ---------------
    @pl.when(i == 0)
    def _wait_edges():
        pltpu.make_async_copy(e12t_hbm, e12t, sems.at[0]).wait()

    e12 = jnp.dot(vb, e12t[...], preferred_element_type=jnp.float32)  # (3T, 2Fp)
    e1x = e12[0 * T:1 * T, 0:Fp]
    e1y = e12[1 * T:2 * T, 0:Fp]
    e1z = e12[2 * T:3 * T, 0:Fp]
    e2x = e12[0 * T:1 * T, Fp:2 * Fp]
    e2y = e12[1 * T:2 * T, Fp:2 * Fp]
    e2z = e12[2 * T:3 * T, Fp:2 * Fp]

    # ---- face normals: cross product on (T, Fp) slabs (pure VPU) -----------
    fnx = e1y * e2z - e1z * e2y
    fny = e1z * e2x - e1x * e2z
    fnz = e1x * e2y - e1y * e2x
    fn = jnp.concatenate([fnx, fny, fnz], axis=0).astype(jnp.bfloat16)  # (3T, Fp)

    # ---- vertex normals: scatter-add over incident faces -------------------
    @pl.when(i == 0)
    def _wait_inc():
        pltpu.make_async_copy(inct_hbm, inct, sems.at[1]).wait()

    vn = jnp.dot(fn, inct[...], preferred_element_type=jnp.float32)     # (3T, Np)
    vnx = vn[0 * T:1 * T, :]
    vny = vn[1 * T:2 * T, :]
    vnz = vn[2 * T:3 * T, :]
    inv_len = lax.rsqrt(jnp.maximum(vnx * vnx + vny * vny + vnz * vnz, 1e-24))

    tnx = tn[0 * T:1 * T, :]
    tny = tn[1 * T:2 * T, :]
    tnz = tn[2 * T:3 * T, :]
    inv_tn = lax.rsqrt(jnp.maximum(tnx * tnx + tny * tny + tnz * tnz, 1e-16))
    cos = (vnx * tnx + vny * tny + vnz * tnz) * inv_len * inv_tn         # (T, Np)

    # ---- uniform graph Laplacian: (v @ A) * inv_deg - v (exact bf16 A) -----
    @pl.when(i == 0)
    def _wait_adj():
        pltpu.make_async_copy(at_hbm, at, sems.at[2]).wait()

    lap = jnp.dot(vb, at[...], preferred_element_type=jnp.float32) * inv_deg - v

    # ---- per-vertex (lane-dense) partial sums, accumulated over batch tiles
    dpos = v - tv
    dlap = lap - tl
    pos_p = jnp.sum(dpos * dpos, axis=0, keepdims=True)    # (1, Np)
    cos_p = jnp.sum(cos, axis=0, keepdims=True)            # (1, Np)
    lap_p = jnp.sum(dlap * dlap, axis=0, keepdims=True)    # (1, Np)
    out_ref[...] += jnp.concatenate([pos_p, cos_p, lap_p], axis=0)  # (3, Np)


# ----------------------------------------------------------------------------
# Wrapper (pole mean, padding, batch tiling, final reduction + scaling)
# ----------------------------------------------------------------------------
def _pick_batch_tile(B, max_rows=256):
    """Pick T batches per grid step so the MXU LHS has ~max_rows rows."""
    t_cap = max(1, max_rows // 3)          # ~85 -> 3T ~ 256 (v6e/v7x MXU)
    if B <= t_cap:
        return B, 1
    num_tiles = -(-B // t_cap)
    T = _round_up(-(-B // num_tiles), 8)   # multiple of 8: aligned (T, lane) slabs
    num_tiles = -(-B // T)
    return T, num_tiles


def _tile_channel_major(x, T, num_tiles):
    """(B, 3, Np) -> (num_tiles, 3*T, Np), row c*T + t <- (batch t, channel c)."""
    B, C, Np = x.shape
    Bp = num_tiles * T
    x = jnp.pad(x, ((0, Bp - B), (0, 0), (0, 0)))
    x = x.reshape(num_tiles, T, C, Np).transpose(0, 2, 1, 3)
    return x.reshape(num_tiles, C * T, Np)


def point2point_loss(inputs, target, mesh, factor_pos, factor_nor, factor_lap):
    B, C, H, W = inputs.shape
    bh = mesh["base_height"]
    N, Np, Fp = mesh["N"], mesh["N_pad"], mesh["F_pad"]

    # v stays channel-major (B, 3, N): xyz on sublanes, vertices on lanes.
    v_tmp = inputs.reshape(B, C, H * W)
    ys = jnp.stack([jnp.arange(5) * bh, jnp.arange(1, 6) * bh - 1])   # (2, 5)
    xs = jnp.array([[0], [W - 1]])                                    # (2, 1)
    v_poles = jnp.mean(inputs[:, :, ys, xs], axis=-1)                 # (B, 3, 2)
    v = jnp.concatenate([v_tmp, v_poles], axis=2).astype(jnp.float32)  # (B,3,N)
    v = jnp.pad(v, ((0, 0), (0, 0), (0, Np - N)))

    tgt = jnp.pad(target.astype(jnp.float32), ((0, 0), (0, 0), (0, Np - N)))
    tv, tn, tl = tgt[:, 0:3], tgt[:, 3:6], tgt[:, 6:9]                # (B,3,Np) each

    # Batch-tile everything into channel-major (num_tiles, 3T, Np) slabs.
    T, num_tiles = _pick_batch_tile(B)
    v_t = _tile_channel_major(v, T, num_tiles)
    tv_t = _tile_channel_major(tv, T, num_tiles)
    tn_t = _tile_channel_major(tn, T, num_tiles)
    tl_t = _tile_channel_major(tl, T, num_tiles)

    grid_spec = pltpu.PrefetchScalarGridSpec(
        num_scalar_prefetch=0,
        grid=(num_tiles,),
        in_specs=[
            pl.BlockSpec((None, 3 * T, Np), lambda i: (i, 0, 0)),   # v tile
            pl.BlockSpec((None, 3 * T, Np), lambda i: (i, 0, 0)),   # target pos
            pl.BlockSpec((None, 3 * T, Np), lambda i: (i, 0, 0)),   # target normal
            pl.BlockSpec((None, 3 * T, Np), lambda i: (i, 0, 0)),   # target lap
            pl.BlockSpec((1, Np), lambda i: (0, 0)),                # inv_deg (tiny)
            pl.BlockSpec(memory_space=pl.ANY),                      # [E1^T|E2^T] HBM
            pl.BlockSpec(memory_space=pl.ANY),                      # INC^T      HBM
            pl.BlockSpec(memory_space=pl.ANY),                      # A^T        HBM
        ],
        out_specs=pl.BlockSpec((3, Np), lambda i: (0, 0)),          # pos/cos/lap sums
        scratch_shapes=[
            pltpu.VMEM((Np, 2 * Fp), jnp.bfloat16),     # [E1^T | E2^T]
            pltpu.VMEM((Fp, Np), jnp.bfloat16),         # INC^T
            pltpu.VMEM((Np, Np), jnp.bfloat16),         # A^T (0/1, exact)
            pltpu.SemaphoreType.DMA((3,)),
        ],
    )

    # Generation-aware scoped-VMEM budget: resident bf16 mesh operators +
    # double-buffered per-tile I/O + headroom, capped below physical VMEM
    # (64 MiB/TC on v7x, 128 MiB on v5e/v6e).
    mesh_bytes = Np * (2 * Fp) * 2 + Fp * Np * 2 + Np * Np * 2
    io_bytes = 2 * (4 * (3 * T) * Np * 4 + Np * 4) + 3 * Np * 4
    try:
        phys_vmem = int(pltpu.get_tpu_info().vmem_capacity_bytes)
    except Exception:
        phys_vmem = 64 << 20
    vmem_limit = int(min(mesh_bytes + io_bytes + (16 << 20),
                         int(phys_vmem * 0.85)))
    vmem_limit = max(vmem_limit, 16 << 20)

    acc = pl.pallas_call(
        p2p_loss_kernel,
        out_shape=jax.ShapeDtypeStruct((3, Np), jnp.float32),
        grid_spec=grid_spec,
        compiler_params=pltpu.CompilerParams(
            dimension_semantics=("arbitrary",),
            vmem_limit_bytes=vmem_limit),
    )(v_t, tv_t, tn_t, tl_t, mesh["INV_DEG"],
      mesh["E12T"], mesh["INCT"], mesh["AT"])

    # Final cross-lane reductions happen once, outside the hot loop.
    # (padded lanes / padded batch rows contribute exactly 0 to every sum)
    l_pos = jnp.sum(acc[0]) / (B * N * 3)
    l_cos = 1.0 - jnp.sum(acc[1]) / (B * N)
    l_lap = jnp.sum(acc[2]) / (B * N * 3)
    return factor_pos * l_pos + factor_nor * l_cos + factor_lap * l_lap


# ----------------------------------------------------------------------------
# Pure-JAX f32 reference (same math, for validation)
# ----------------------------------------------------------------------------
def reference_loss(inputs, target, mesh, factor_pos, factor_nor, factor_lap):
    B, C, H, W = inputs.shape
    bh = mesh["base_height"]
    v_tmp = inputs.reshape(B, C, H * W)
    ys = jnp.stack([jnp.arange(5) * bh, jnp.arange(1, 6) * bh - 1])
    xs = jnp.array([[0], [W - 1]])
    v_poles = jnp.mean(inputs[:, :, ys, xs], axis=-1)
    v = jnp.concatenate([v_tmp, v_poles], axis=2).transpose(0, 2, 1)   # (B,N,3)
    tgt = target.transpose(0, 2, 1)
    tv, tn, tl = tgt[..., 0:3], tgt[..., 3:6], tgt[..., 6:9]

    e1 = jnp.einsum("fn,bnc->bfc", mesh["E1_f32"], v)
    e2 = jnp.einsum("fn,bnc->bfc", mesh["E2_f32"], v)
    fn = jnp.cross(e1, e2)
    vn = jnp.einsum("nf,bfc->bnc", mesh["INC_f32"], fn)
    vn = vn / jnp.maximum(jnp.linalg.norm(vn, axis=-1, keepdims=True), 1e-12)
    lap = jnp.einsum("nm,bmc->bnc", mesh["ADJ_f32"], v) - v

    l_pos = jnp.mean((v - tv) ** 2)
    na = jnp.maximum(jnp.linalg.norm(vn, axis=-1), 1e-8)
    nb = jnp.maximum(jnp.linalg.norm(tn, axis=-1), 1e-8)
    cosim = jnp.sum(vn * tn, axis=-1) / (na * nb)
    l_cos = jnp.mean(1.0 - cosim)
    l_lap = jnp.mean((lap - tl) ** 2)
    return factor_pos * l_pos + factor_nor * l_cos + factor_lap * l_lap


if __name__ == "__main__":
    subdivisions = 1                       # H=10, W=4, N=42 verts, F=80 faces
    factor_pos, factor_nor, factor_lap = 1.0, 0.1, 0.5

    mesh = build_mesh(subdivisions)
    B = 2
    key = jax.random.PRNGKey(0)
    k1, k2 = jax.random.split(key)
    inputs = jax.random.normal(k1, (B, 3, mesh["H"], mesh["W"]), dtype=jnp.float32)
    target = jax.random.normal(k2, (B, 9, mesh["N"]), dtype=jnp.float32)

    loss = point2point_loss(inputs, target, mesh,
                            factor_pos, factor_nor, factor_lap)
    loss = jax.block_until_ready(loss)

    ref = reference_loss(inputs, target, mesh,
                         factor_pos, factor_nor, factor_lap)
    # bf16 MXU operands bound the per-term deviation to ~1e-3
    np.testing.assert_allclose(float(loss), float(ref), rtol=2e-3, atol=2e-3)
    assert np.isfinite(float(loss))
    print("KERNEL_OK")
</pallas_src>

<mosaic_0001>
module attributes {stable_mosaic.version = 11 : i64} {
  func.func @p2p_loss_kernel(%arg0: i32, %arg1: memref<1x6x128xf32, #tpu.memory_space<vmem>>, %arg2: memref<1x6x128xf32, #tpu.memory_space<vmem>>, %arg3: memref<1x6x128xf32, #tpu.memory_space<vmem>>, %arg4: memref<1x6x128xf32, #tpu.memory_space<vmem>>, %arg5: memref<1x128xf32, #tpu.memory_space<vmem>>, %arg6: memref<128x256xbf16, #tpu.memory_space<any>>, %arg7: memref<128x128xbf16, #tpu.memory_space<any>>, %arg8: memref<128x128xbf16, #tpu.memory_space<any>>, %arg9: memref<3x128xf32, #tpu.memory_space<vmem>>, %arg10: memref<128x256xbf16, #tpu.memory_space<vmem>>, %arg11: memref<128x128xbf16, #tpu.memory_space<vmem>>, %arg12: memref<128x128xbf16, #tpu.memory_space<vmem>>, %arg13: memref<3x!tpu.dma_semaphore, #tpu.memory_space<semaphore_mem>>) attributes {dimension_semantics = [#tpu.dimension_semantics<arbitrary>], iteration_bounds = array<i64: 1>, scalar_prefetch = 0 : i64, scratch_operands = 4 : i64, tpu.core_type = #tpu.core_type<tc>, window_params = [{transform_indices = @transform_0, window_bounds = array<i64: 1, 6, 128>}, {transform_indices = @transform_1, window_bounds = array<i64: 1, 6, 128>}, {transform_indices = @transform_2, window_bounds = array<i64: 1, 6, 128>}, {transform_indices = @transform_3, window_bounds = array<i64: 1, 6, 128>}, {pipeline_mode = #tpu.pipeline_mode<synchronous>, transform_indices = @transform_4, window_bounds = array<i64: 1, 128>}, {}, {}, {}, {pipeline_mode = #tpu.pipeline_mode<synchronous>, transform_indices = @transform_8, window_bounds = array<i64: 3, 128>}]} {
    %c0_i32 = arith.constant 0 : i32
    %0 = arith.cmpi eq, %arg0, %c0_i32 : i32
    %1 = arith.extui %0 : i1 to i32
    %c0_i32_0 = arith.constant 0 : i32
    %2 = arith.cmpi ne, %1, %c0_i32_0 : i32
    scf.if %2 {
      %c0_i32_37 = arith.constant 0 : i32
      %91 = tpu.memref_slice %arg13[%c0_i32_37] : memref<3x!tpu.dma_semaphore, #tpu.memory_space<semaphore_mem>> -> memref<1x!tpu.dma_semaphore, #tpu.memory_space<semaphore_mem>>
      %92 = tpu.memref_squeeze %91 : memref<1x!tpu.dma_semaphore, #tpu.memory_space<semaphore_mem>> -> memref<!tpu.dma_semaphore, #tpu.memory_space<semaphore_mem>>
      tpu.enqueue_dma source(%arg6 : memref<128x256xbf16, #tpu.memory_space<any>>) target(%arg10 : memref<128x256xbf16, #tpu.memory_space<vmem>>) target_semaphore(%92 : memref<!tpu.dma_semaphore, #tpu.memory_space<semaphore_mem>>)
      %c1_i32 = arith.constant 1 : i32
      %93 = tpu.memref_slice %arg13[%c1_i32] : memref<3x!tpu.dma_semaphore, #tpu.memory_space<semaphore_mem>> -> memref<1x!tpu.dma_semaphore, #tpu.memory_space<semaphore_mem>>
      %94 = tpu.memref_squeeze %93 : memref<1x!tpu.dma_semaphore, #tpu.memory_space<semaphore_mem>> -> memref<!tpu.dma_semaphore, #tpu.memory_space<semaphore_mem>>
      tpu.enqueue_dma source(%arg7 : memref<128x128xbf16, #tpu.memory_space<any>>) target(%arg11 : memref<128x128xbf16, #tpu.memory_space<vmem>>) target_semaphore(%94 : memref<!tpu.dma_semaphore, #tpu.memory_space<semaphore_mem>>)
      %c2_i32 = arith.constant 2 : i32
      %95 = tpu.memref_slice %arg13[%c2_i32] : memref<3x!tpu.dma_semaphore, #tpu.memory_space<semaphore_mem>> -> memref<1x!tpu.dma_semaphore, #tpu.memory_space<semaphore_mem>>
      %96 = tpu.memref_squeeze %95 : memref<1x!tpu.dma_semaphore, #tpu.memory_space<semaphore_mem>> -> memref<!tpu.dma_semaphore, #tpu.memory_space<semaphore_mem>>
      tpu.enqueue_dma source(%arg8 : memref<128x128xbf16, #tpu.memory_space<any>>) target(%arg12 : memref<128x128xbf16, #tpu.memory_space<vmem>>) target_semaphore(%96 : memref<!tpu.dma_semaphore, #tpu.memory_space<semaphore_mem>>)
      %cst_38 = arith.constant 0.000000e+00 : f32
      %97 = vector.broadcast %cst_38 : f32 to vector<3x128xf32>
      %c0_39 = arith.constant 0 : index
      %c0_40 = arith.constant 0 : index
      %98 = vector.load %arg9[%c0_39, %c0_40] : memref<3x128xf32, #tpu.memory_space<vmem>>, vector<3x128xf32>
      tpu.vector_store %arg9[%c0_39, %c0_40], %97 {strides = array<i32>} : memref<3x128xf32, #tpu.memory_space<vmem>>, vector<3x128xf32>,
    } else {
    }
    %c0 = arith.constant 0 : index
    %c0_1 = arith.constant 0 : index
    %c0_2 = arith.constant 0 : index
    %3 = vector.load %arg1[%c0, %c0_1, %c0_2] : memref<1x6x128xf32, #tpu.memory_space<vmem>>, vector<1x6x128xf32>
    %4 = vector.shape_cast %3 : vector<1x6x128xf32> to vector<6x128xf32>
    %c0_3 = arith.constant 0 : index
    %c0_4 = arith.constant 0 : index
    %c0_5 = arith.constant 0 : index
    %5 = vector.load %arg2[%c0_3, %c0_4, %c0_5] : memref<1x6x128xf32, #tpu.memory_space<vmem>>, vector<1x6x128xf32>
    %6 = vector.shape_cast %5 : vector<1x6x128xf32> to vector<6x128xf32>
    %c0_6 = arith.constant 0 : index
    %c0_7 = arith.constant 0 : index
    %c0_8 = arith.constant 0 : index
    %7 = vector.load %arg3[%c0_6, %c0_7, %c0_8] : memref<1x6x128xf32, #tpu.memory_space<vmem>>, vector<1x6x128xf32>
    %8 = vector.shape_cast %7 : vector<1x6x128xf32> to vector<6x128xf32>
    %c0_9 = arith.constant 0 : index
    %c0_10 = arith.constant 0 : index
    %c0_11 = arith.constant 0 : index
    %9 = vector.load %arg4[%c0_9, %c0_10, %c0_11] : memref<1x6x128xf32, #tpu.memory_space<vmem>>, vector<1x6x128xf32>
    %10 = vector.shape_cast %9 : vector<1x6x128xf32> to vector<6x128xf32>
    %c0_12 = arith.constant 0 : index
    %c0_13 = arith.constant 0 : index
    %11 = vector.load %arg5[%c0_12, %c0_13] : memref<1x128xf32, #tpu.memory_space<vmem>>, vector<1x128xf32>
    %12 = arith.truncf %4 : vector<6x128xf32> to vector<6x128xbf16>
    %c0_i32_14 = arith.constant 0 : i32
    %13 = arith.cmpi eq, %arg0, %c0_i32_14 : i32
    %14 = arith.extui %13 : i1 to i32
    %c0_i32_15 = arith.constant 0 : i32
    %15 = arith.cmpi ne, %14, %c0_i32_15 : i32
    scf.if %15 {
      %c0_i32_37 = arith.constant 0 : i32
      %91 = tpu.memref_slice %arg13[%c0_i32_37] : memref<3x!tpu.dma_semaphore, #tpu.memory_space<semaphore_mem>> -> memref<1x!tpu.dma_semaphore, #tpu.memory_space<semaphore_mem>>
      %92 = tpu.memref_squeeze %91 : memref<1x!tpu.dma_semaphore, #tpu.memory_space<semaphore_mem>> -> memref<!tpu.dma_semaphore, #tpu.memory_space<semaphore_mem>>
      tpu.wait_dma2 semaphore(%92 : memref<!tpu.dma_semaphore, #tpu.memory_space<semaphore_mem>>) src(%arg6 : memref<128x256xbf16, #tpu.memory_space<any>>) dst(%arg10 : memref<128x256xbf16, #tpu.memory_space<vmem>>)
    } else {
    }
    %c0_16 = arith.constant 0 : index
    %c0_17 = arith.constant 0 : index
    %16 = vector.load %arg10[%c0_16, %c0_17] : memref<128x256xbf16, #tpu.memory_space<vmem>>, vector<128x256xbf16>
    %cst = arith.constant dense<0.000000e+00> : vector<6x256xf32>
    %17 = tpu.matmul %12, %16, %cst {dimension_numbers = #tpu.dot_dimension_numbers<[1], [0], [0], [1], [0, 0, 1, 1], [], []>} : vector<6x128xbf16>, vector<128x256xbf16>, vector<6x256xf32> -> vector<6x256xf32>
    %18 = vector.extract_strided_slice %17 {offsets = [0, 0], sizes = [2, 128], strides = [1, 1]} : vector<6x256xf32> to vector<2x128xf32>
    %19 = vector.extract_strided_slice %17 {offsets = [2, 0], sizes = [2, 128], strides = [1, 1]} : vector<6x256xf32> to vector<2x128xf32>
    %20 = vector.extract_strided_slice %17 {offsets = [4, 0], sizes = [2, 128], strides = [1, 1]} : vector<6x256xf32> to vector<2x128xf32>
    %21 = vector.extract_strided_slice %17 {offsets = [0, 128], sizes = [2, 128], strides = [1, 1]} : vector<6x256xf32> to vector<2x128xf32>
    %22 = vector.extract_strided_slice %17 {offsets = [2, 128], sizes = [2, 128], strides = [1, 1]} : vector<6x256xf32> to vector<2x128xf32>
    %23 = vector.extract_strided_slice %17 {offsets = [4, 128], sizes = [2, 128], strides = [1, 1]} : vector<6x256xf32> to vector<2x128xf32>
    %24 = arith.mulf %19, %23 : vector<2x128xf32>
    %25 = arith.mulf %20, %22 : vector<2x128xf32>
    %26 = arith.subf %24, %25 : vector<2x128xf32>
    %27 = arith.mulf %20, %21 : vector<2x128xf32>
    %28 = arith.mulf %18, %23 : vector<2x128xf32>
    %29 = arith.subf %27, %28 : vector<2x128xf32>
    %30 = arith.mulf %18, %22 : vector<2x128xf32>
    %31 = arith.mulf %19, %21 : vector<2x128xf32>
    %32 = arith.subf %30, %31 : vector<2x128xf32>
    %33 = tpu.concatenate %26, %29, %32 in 0 : vector<2x128xf32>, vector<2x128xf32>, vector<2x128xf32> -> vector<6x128xf32>
    %34 = arith.truncf %33 : vector<6x128xf32> to vector<6x128xbf16>
    %c0_i32_18 = arith.constant 0 : i32
    %35 = arith.cmpi eq, %arg0, %c0_i32_18 : i32
    %36 = arith.extui %35 : i1 to i32
    %c0_i32_19 = arith.constant 0 : i32
    %37 = arith.cmpi ne, %36, %c0_i32_19 : i32
    scf.if %37 {
      %c1_i32 = arith.constant 1 : i32
      %91 = tpu.memref_slice %arg13[%c1_i32] : memref<3x!tpu.dma_semaphore, #tpu.memory_space<semaphore_mem>> -> memref<1x!tpu.dma_semaphore, #tpu.memory_space<semaphore_mem>>
      %92 = tpu.memref_squeeze %91 : memref<1x!tpu.dma_semaphore, #tpu.memory_space<semaphore_mem>> -> memref<!tpu.dma_semaphore, #tpu.memory_space<semaphore_mem>>
      tpu.wait_dma2 semaphore(%92 : memref<!tpu.dma_semaphore, #tpu.memory_space<semaphore_mem>>) src(%arg7 : memref<128x128xbf16, #tpu.memory_space<any>>) dst(%arg11 : memref<128x128xbf16, #tpu.memory_space<vmem>>)
    } else {
    }
    %c0_20 = arith.constant 0 : index
    %c0_21 = arith.constant 0 : index
    %38 = vector.load %arg11[%c0_20, %c0_21] : memref<128x128xbf16, #tpu.memory_space<vmem>>, vector<128x128xbf16>
    %cst_22 = arith.constant dense<0.000000e+00> : vector<6x128xf32>
    %39 = tpu.matmul %34, %38, %cst_22 {dimension_numbers = #tpu.dot_dimension_numbers<[1], [0], [0], [1], [0, 0, 1, 1], [], []>} : vector<6x128xbf16>, vector<128x128xbf16>, vector<6x128xf32> -> vector<6x128xf32>
    %40 = vector.extract_strided_slice %39 {offsets = [0, 0], sizes = [2, 128], strides = [1, 1]} : vector<6x128xf32> to vector<2x128xf32>
    %41 = vector.extract_strided_slice %39 {offsets = [2, 0], sizes = [2, 128], strides = [1, 1]} : vector<6x128xf32> to vector<2x128xf32>
    %42 = vector.extract_strided_slice %39 {offsets = [4, 0], sizes = [2, 128], strides = [1, 1]} : vector<6x128xf32> to vector<2x128xf32>
    %43 = arith.mulf %40, %40 : vector<2x128xf32>
    %44 = arith.mulf %41, %41 : vector<2x128xf32>
    %45 = arith.addf %43, %44 : vector<2x128xf32>
    %46 = arith.mulf %42, %42 : vector<2x128xf32>
    %47 = arith.addf %45, %46 : vector<2x128xf32>
    %cst_23 = arith.constant 1.000000e-24 : f32
    %48 = vector.broadcast %cst_23 : f32 to vector<2x128xf32>
    %49 = arith.maximumf %47, %48 : vector<2x128xf32>
    %50 = math.rsqrt %49 : vector<2x128xf32>
    %51 = vector.extract_strided_slice %8 {offsets = [0, 0], sizes = [2, 128], strides = [1, 1]} : vector<6x128xf32> to vector<2x128xf32>
    %52 = vector.extract_strided_slice %8 {offsets = [2, 0], sizes = [2, 128], strides = [1, 1]} : vector<6x128xf32> to vector<2x128xf32>
    %53 = vector.extract_strided_slice %8 {offsets = [4, 0], sizes = [2, 128], strides = [1, 1]} : vector<6x128xf32> to vector<2x128xf32>
    %54 = arith.mulf %51, %51 : vector<2x128xf32>
    %55 = arith.mulf %52, %52 : vector<2x128xf32>
    %56 = arith.addf %54, %55 : vector<2x128xf32>
    %57 = arith.mulf %53, %53 : vector<2x128xf32>
    %58 = arith.addf %56, %57 : vector<2x128xf32>
    %cst_24 = arith.constant 1.000000e-16 : f32
    %59 = vector.broadcast %cst_24 : f32 to vector<2x128xf32>
    %60 = arith.maximumf %58, %59 : vector<2x128xf32>
    %61 = math.rsqrt %60 : vector<2x128xf32>
    %62 = arith.mulf %40, %51 : vector<2x128xf32>
    %63 = arith.mulf %41, %52 : vector<2x128xf32>
    %64 = arith.addf %62, %63 : vector<2x128xf32>
    %65 = arith.mulf %42, %53 : vector<2x128xf32>
    %66 = arith.addf %64, %65 : vector<2x128xf32>
    %67 = arith.mulf %66, %50 : vector<2x128xf32>
    %68 = arith.mulf %67, %61 : vector<2x128xf32>
    %c0_i32_25 = arith.constant 0 : i32
    %69 = arith.cmpi eq, %arg0, %c0_i32_25 : i32
    %70 = arith.extui %69 : i1 to i32
    %c0_i32_26 = arith.constant 0 : i32
    %71 = arith.cmpi ne, %70, %c0_i32_26 : i32
    scf.if %71 {
      %c2_i32 = arith.constant 2 : i32
      %91 = tpu.memref_slice %arg13[%c2_i32] : memref<3x!tpu.dma_semaphore, #tpu.memory_space<semaphore_mem>> -> memref<1x!tpu.dma_semaphore, #tpu.memory_space<semaphore_mem>>
      %92 = tpu.memref_squeeze %91 : memref<1x!tpu.dma_semaphore, #tpu.memory_space<semaphore_mem>> -> memref<!tpu.dma_semaphore, #tpu.memory_space<semaphore_mem>>
      tpu.wait_dma2 semaphore(%92 : memref<!tpu.dma_semaphore, #tpu.memory_space<semaphore_mem>>) src(%arg8 : memref<128x128xbf16, #tpu.memory_space<any>>) dst(%arg12 : memref<128x128xbf16, #tpu.memory_space<vmem>>)
    } else {
    }
    %c0_27 = arith.constant 0 : index
    %c0_28 = arith.constant 0 : index
    %72 = vector.load %arg12[%c0_27, %c0_28] : memref<128x128xbf16, #tpu.memory_space<vmem>>, vector<128x128xbf16>
    %cst_29 = arith.constant dense<0.000000e+00> : vector<6x128xf32>
    %73 = tpu.matmul %12, %72, %cst_29 {dimension_numbers = #tpu.dot_dimension_numbers<[1], [0], [0], [1], [0, 0, 1, 1], [], []>} : vector<6x128xbf16>, vector<128x128xbf16>, vector<6x128xf32> -> vector<6x128xf32>
    %74 = vector.broadcast %11 : vector<1x128xf32> to vector<6x128xf32>
    %75 = arith.mulf %73, %74 : vector<6x128xf32>
    %76 = arith.subf %75, %4 : vector<6x128xf32>
    %77 = arith.subf %4, %6 : vector<6x128xf32>
    %78 = arith.subf %76, %10 : vector<6x128xf32>
    %79 = arith.mulf %77, %77 : vector<6x128xf32>
    %cst_30 = arith.constant dense<0.000000e+00> : vector<128xf32>
    %80 = vector.multi_reduction <add>, %79, %cst_30 [0] : vector<6x128xf32> to vector<128xf32>
    %81 = vector.shape_cast %80 : vector<128xf32> to vector<1x128xf32>
    %cst_31 = arith.constant dense<0.000000e+00> : vector<128xf32>
    %82 = vector.multi_reduction <add>, %68, %cst_31 [0] : vector<2x128xf32> to vector<128xf32>
    %83 = vector.shape_cast %82 : vector<128xf32> to vector<1x128xf32>
    %84 = arith.mulf %78, %78 : vector<6x128xf32>
    %cst_32 = arith.constant dense<0.000000e+00> : vector<128xf32>
    %85 = vector.multi_reduction <add>, %84, %cst_32 [0] : vector<6x128xf32> to vector<128xf32>
    %86 = vector.shape_cast %85 : vector<128xf32> to vector<1x128xf32>
    %c0_33 = arith.constant 0 : index
    %c0_34 = arith.constant 0 : index
    %87 = vector.load %arg9[%c0_33, %c0_34] : memref<3x128xf32, #tpu.memory_space<vmem>>, vector<3x128xf32>
    %88 = tpu.concatenate %81, %83, %86 in 0 : vector<1x128xf32>, vector<1x128xf32>, vector<1x128xf32> -> vector<3x128xf32>
    %89 = arith.addf %87, %88 : vector<3x128xf32>
    %c0_35 = arith.constant 0 : index
    %c0_36 = arith.constant 0 : index
    %90 = vector.load %arg9[%c0_35, %c0_36] : memref<3x128xf32, #tpu.memory_space<vmem>>, vector<3x128xf32>
    tpu.vector_store %arg9[%c0_35, %c0_36], %89 {strides = array<i32>} : memref<3x128xf32, #tpu.memory_space<vmem>>, vector<3x128xf32>,
    return
  }
  func.func @transform_0(%arg0: i32) -> (i32, i32, i32) {
    %c0_i32 = arith.constant 0 : i32
    %c0_i32_0 = arith.constant 0 : i32
    %c0_i32_1 = arith.constant 0 : i32
    return %arg0, %c0_i32, %c0_i32_0 : i32, i32, i32
  }
  func.func @transform_1(%arg0: i32) -> (i32, i32, i32) {
    %c0_i32 = arith.constant 0 : i32
    %c0_i32_0 = arith.constant 0 : i32
    %c0_i32_1 = arith.constant 0 : i32
    return %arg0, %c0_i32, %c0_i32_0 : i32, i32, i32
  }
  func.func @transform_2(%arg0: i32) -> (i32, i32, i32) {
    %c0_i32 = arith.constant 0 : i32
    %c0_i32_0 = arith.constant 0 : i32
    %c0_i32_1 = arith.constant 0 : i32
    return %arg0, %c0_i32, %c0_i32_0 : i32, i32, i32
  }
  func.func @transform_3(%arg0: i32) -> (i32, i32, i32) {
    %c0_i32 = arith.constant 0 : i32
    %c0_i32_0 = arith.constant 0 : i32
    %c0_i32_1 = arith.constant 0 : i32
    return %arg0, %c0_i32, %c0_i32_0 : i32, i32, i32
  }
  func.func @transform_4(%arg0: i32) -> (i32, i32) {
    %c0_i32 = arith.constant 0 : i32
    %c0_i32_0 = arith.constant 0 : i32
    %c0_i32_1 = arith.constant 0 : i32
    return %c0_i32, %c0_i32_0 : i32, i32
  }
  func.func @transform_8(%arg0: i32) -> (i32, i32) {
    %c0_i32 = arith.constant 0 : i32
    %c0_i32_0 = arith.constant 0 : i32
    %c0_i32_1 = arith.constant 0 : i32
    return %c0_i32, %c0_i32_0 : i32, i32
  }
}

</mosaic_0001>

<bundles_post_ra>
// kernel: tpu_custom_call.1
= control target key start
LH: loop header
LB: loop body
LE: loop exit
PB: predicated region body
PF: predicated region fallthrough
CT: control target
= control target key end

     0   :  { %13 = vsyncpa [#allocation7], 0  ;;  %s840_s9 = smov [#allocation2]   ;;  %s989_s0 = inlined_call_operand.vmem [shape: f32[1,6,128], index: 0, kind: input, shape index: {}]   ;;  %s990_s1 = inlined_call_operand.vmem [shape: f32[1,6,128], index: 1, kind: input, shape index: {}]   ;;  %s991_s2 = inlined_call_operand.vmem [shape: f32[1,6,128], index: 2, kind: input, shape index: {}]   ;;  %s992_s3 = inlined_call_operand.vmem [shape: f32[1,6,128], index: 3, kind: input, shape index: {}]   ;;  %s993_s4 = inlined_call_operand.vmem [shape: f32[1,128], index: 4, kind: input, shape index: {}]   ;;  %s994_s5 = inlined_call_operand.hbm [shape: bf16[128,256], index: 5, kind: input, shape index: {}]   ;;  %s995_s6 = inlined_call_operand.vmem [shape: bf16[128,128], index: 6, kind: input, shape index: {}]   ;;  %s996_s7 = inlined_call_operand.hbm [shape: bf16[128,128], index: 7, kind: input, shape index: {}]   ;;  %s997_s8 = inlined_call_operand.hbm [shape: f32[3,128], index: 8, kind: output, shape index: {}]  }
   0x1   :  { %v74_v0 = vld [vmem:[%s995_s6] sm:$0xff]  ;;  %v76_v1 = vld [vmem:[%s995_s6 + $0x8] sm:$0xff]  ;;  %s36_s10 = sshll.u32 %s840_s9, 4  ;;  %v78_v2 = vld [vmem:[%s995_s6 + $0x10] sm:$0xff]  ;;  %s37_s10 = int_to_ptr.vmem [resolvable:$true] %s36_s10 }
   0x2   :  { %75 = vst [vmem:[#allocation3] sm:$0xff] %v74_v0  ;;  %77 = vst [vmem:[#allocation3 + $0x8] sm:$0xff] %v76_v1  ;;  %v80_v3 = vld [vmem:[%s995_s6 + $0x18] sm:$0xff]  ;;  %v82_v4 = vld [vmem:[%s995_s6 + $0x20] sm:$0xff]  ;;  %s780_s23 = scalar_lea.vmem %s37_s10, 2048  ;;  %p785_p1 = scmp.lt.s32.totalorder %s37_s10, %s37_s10 }
   0x3   :  { %79 = vst [vmem:[#allocation3 + $0x10] sm:$0xff] %v78_v2  ;;  %81 = vst [vmem:[#allocation3 + $0x18] sm:$0xff] %v80_v3  ;;  %v84_v5 = vld [vmem:[%s995_s6 + $0x28] sm:$0xff]  ;;  %v86_v6 = vld [vmem:[%s995_s6 + $0x30] sm:$0xff]  ;;  %p781_p0 = scmp.ne.s32.totalorder %s37_s10, %s780_s23  ;;  %p786_p2 = scmp.lt.s32.totalorder %s780_s23, %s780_s23 }
   0x4   :  { %83 = vst [vmem:[#allocation3 + $0x20] sm:$0xff] %v82_v4  ;;  %v88_v7 = vld [vmem:[%s995_s6 + $0x38] sm:$0xff] }
   0x5   :  { %p787_p3 = por %p786_p2, %p785_p1 }
   0x7   :  { %p788_p4 = pnand %p787_p3, %p781_p0 }
   0x9   :  { %791 = shalt.err (!%p788_p4)  }
   0xa   :  { %39 = dma.hbm_to_vmem [thread:$0]  %s994_s5, 2048, %s37_s10, [#allocation5]  ;;  %85 = vst [vmem:[#allocation3 + $0x28] sm:$0xff] %v84_v5  ;;  %87 = vst [vmem:[#allocation3 + $0x30] sm:$0xff] %v86_v6 }
   0xb   :  { %89 = vst [vmem:[#allocation3 + $0x38] sm:$0xff] %v88_v7 }
   0xc   :  { %97 = vsyncadd [#allocation5 + $0x1], 1024  ;;  %v921_v8 = vld [vmem:[%s989_s0] sm:$0x3f]  ;;  %s841_s6 = smov [#allocation4]   ;;  %v842_v9 = vmov 0.0  }
   0xd   :  { %s106_s28 = sshll.u32 %s841_s6, 4  ;;  %110 = vst [vmem:[#allocation6] sm:$0x7] %v842_v9  ;;  %v927_v10 = vld [vmem:[%s990_s1] sm:$0x3f]  ;;  %v936_v12 = vpack.c.bf16 %v921_v8, %v921_v8  ;;  %s107_s28 = int_to_ptr.vmem [resolvable:$true] %s106_s28 }
   0xe   :  { %v932_v11 = vld [vmem:[%s991_s2] sm:$0x3f]  ;;  %s800_s1 = scalar_lea.vmem %s107_s28, 1024  ;;  %p805_p6 = scmp.lt.s32.totalorder %s107_s28, %s107_s28 }
   0xf   :  { %v941_v13 = vld [vmem:[%s992_s3] sm:$0x3f]  ;;  %p801_p5 = scmp.ne.s32.totalorder %s107_s28, %s800_s1  ;;  %p806_p7 = scmp.lt.s32.totalorder %s800_s1, %s800_s1 }
  0x10   :  { %v946_v14 = vld [vmem:[%s993_s4] ss:$0 sm:$0xff] }
  0x11   :  { %p807_p8 = por %p806_p7, %p805_p6 }
  0x13   :  { %p808_p9 = pnand %p807_p8, %p801_p5 }
  0x15   :  { %811 = shalt.err (!%p808_p9)  }
  0x16   :  { %109 = dma.hbm_to_vmem [thread:$0]  %s996_s7, 1024, %s107_s28, [#allocation5 + $0x2] }
  0x17   :  { %832 = dma.done.wait [#allocation5], 2048 }
  0x18   :  { %833 = vsyncadd [#allocation5], 4294965248  ;;  %v843_v15 = vmov 0   ;;  %v728_v16 = vld [vmem:[#allocation2 + $0x74] ss:$8 sps:$4 sm:$0xff]   ;;  %vm287_vm0 = vcmask 1041408  }
  0x19   :  { %252 = vmatprep.mubr.bf16.mxu0 %v843_v15  ;;  %v730_v17 = vld [vmem:[#allocation2 + $0x70] ss:$8 sps:$4 sm:$0xff]   ;;  %220 = vmatprep.subr.bf16.mxu0 %v728_v16  ;;  %v731_v18 = vld [vmem:[#allocation2 + $0x64] ss:$8 sps:$4 sm:$0xff]   ;;  %v733_v19 = vld [vmem:[#allocation2 + $0x60] ss:$8 sps:$4 sm:$0xff]  }
  0x1a   :  { %221 = vmatpush1.bf16.msra.mxu0 %v730_v17  ;;  %v734_v20 = vld [vmem:[#allocation2 + $0x54] ss:$8 sps:$4 sm:$0xff]   ;;  %v736_v21 = vld [vmem:[#allocation2 + $0x50] ss:$8 sps:$4 sm:$0xff]   ;;  %v737_v22 = vld [vmem:[#allocation2 + $0x44] ss:$8 sps:$4 sm:$0xff]  }
  0x1b   :  { %222 = vmatprep.subr.bf16.mxu0 %v731_v18  ;;  %v739_v23 = vld [vmem:[#allocation2 + $0x40] ss:$8 sps:$4 sm:$0xff]   ;;  %v740_v24 = vld [vmem:[#allocation2 + $0x34] ss:$8 sps:$4 sm:$0xff]   ;;  %v742_v25 = vld [vmem:[#allocation2 + $0x30] ss:$8 sps:$4 sm:$0xff]  }
  0x1c   :  { %v743_v26 = vld [vmem:[#allocation2 + $0x24] ss:$8 sps:$4 sm:$0xff]   ;;  %v745_v27 = vld [vmem:[#allocation2 + $0x20] ss:$8 sps:$4 sm:$0xff]   ;;  %v746_v28 = vld [vmem:[#allocation2 + $0x14] ss:$8 sps:$4 sm:$0xff]  }
  0x1d   :  { %v748_v29 = vld [vmem:[#allocation2 + $0x10] ss:$8 sps:$4 sm:$0xff]   ;;  %v749_v30 = vld [vmem:[#allocation2 + $0x4] ss:$8 sps:$4 sm:$0xff]   ;;  %v751_v31 = vld [vmem:[#allocation2] ss:$8 sps:$4 sm:$0xff]  }
  0x1e   :  { %223 = vmatpush1.bf16.msra.mxu0 %v733_v19  ;;  %vm289_vm1 = vcmask 1043456  }
  0x1f   :  { %224 = vmatprep.subr.bf16.mxu0 %v734_v20 }
  0x22   :  { %225 = vmatpush1.bf16.msra.mxu0 %v736_v21 }
  0x23   :  { %226 = vmatprep.subr.bf16.mxu0 %v737_v22 }
  0x26   :  { %227 = vmatpush1.bf16.msra.mxu0 %v739_v23 }
  0x27   :  { %228 = vmatprep.subr.bf16.mxu0 %v740_v24 }
  0x2a   :  { %229 = vmatpush1.bf16.msra.mxu0 %v742_v25 }
  0x2b   :  { %230 = vmatprep.subr.bf16.mxu0 %v743_v26 }
  0x2e   :  { %231 = vmatpush1.bf16.msra.mxu0 %v745_v27 }
  0x2f   :  { %232 = vmatprep.subr.bf16.mxu0 %v746_v28 }
  0x32   :  { %233 = vmatpush1.bf16.msra.mxu0 %v748_v29 }
  0x33   :  { %234 = vmatprep.subr.bf16.mxu0 %v749_v30 }
  0x36   :  { %235 = vmatpush1.bf16.msra.mxu0 %v751_v31 }
  0x39   :  { %253 = vmatmul.mubr.bf16.vlgmr.msra.gmra.mxu0 %v936_v12 }
  0xf9   :  { %v254_v32 = vpop.f32.mrf.mxu0 }
  0xfb   :  { %v256_v33 = vpop.f32.mrf.mxu0 }
  0xfc   :  { %v262_v34 = vrot.slane %v256_v33, 2  ;;  %v265_v35 = vrot.slane %v256_v33, 6  ;;  %v272_v36 = vrot.slane %v256_v33, 4 }
  0xfd   :  { %v258_v37 = vpop.f32.mrf.mxu0 }
  0xfe   :  { %v267_v38 = vmul.f32 %v265_v35, %v254_v32  ;;  %v274_v39 = vmul.f32 %v272_v36, %v254_v32  ;;  %v264_v41 = vmul.f32 %v262_v34, %v254_v32 }
  0xff   :  { %v259_v40 = vpop.f32.mrf.mxu0 }
 0x100   :  { %v269_v42 = vrot.slane %v267_v38, 2  ;;  %v276_v43 = vrot.slane %v274_v39, 4 }
 0x102   :  { %v271_v44 = vsub.f32 %v264_v41, %v269_v42  ;;  %v278_v45 = vsub.f32 %v274_v39, %v276_v43 }
 0x104   :  { %v280_v46 = vrot.slane %v271_v44, 2  ;;  %v283_v47 = vrot.slane %v278_v45, 2  ;;  %v285_v48 = vrot.slane %v271_v44, 4 }
 0x106   :  { %v288_v49 = vsel %vm287_vm0, %v280_v46, %v283_v47 }
 0x107   :  { %v290_v50 = vsel %vm289_vm1, %v288_v49, %v285_v48 }
 0x108   :  { %v291_v51 = vpack.c.bf16 %v290_v50, %v290_v50 }
 0x109   :  { %834 = dma.done.wait [#allocation5 + $0x1], 1024 }
 0x10a   :  { %835 = vsyncadd [#allocation5 + $0x1], 4294966272  ;;  %682 = vmatprep.subr.bf16.mxu1 %v842_v9  ;;  %vm844_vm2 = vmmov 0   ;;  %v752_v52 = vld [vmem:[#allocation3 + $0x38] sm:$0xff]   ;;  %v753_v53 = vld [vmem:[#allocation3 + $0x30] sm:$0xff]   ;;  %v414_v60 = vmul.f32 %v932_v11, %v932_v11 }
 0x10b   :  { %698 = vmatprep.mubr.msk.bf16.mxu1 %vm844_vm2, %v842_v9  ;;  %683 = vmatpush3.bf16.msra.mxu1 %v752_v52  ;;  %v754_v54 = vld [vmem:[#allocation3 + $0x28] sm:$0xff]   ;;  %v755_v55 = vld [vmem:[#allocation3 + $0x20] sm:$0xff]   ;;  %v756_v56 = vld [vmem:[#allocation3 + $0x18] sm:$0xff]  }
 0x10c   :  { %684 = vmatprep.subr.bf16.mxu1 %v842_v9  ;;  %v757_v57 = vld [vmem:[#allocation3 + $0x10] sm:$0xff]   ;;  %v758_v58 = vld [vmem:[#allocation3 + $0x8] sm:$0xff]   ;;  %v759_v59 = vld [vmem:[#allocation3] sm:$0xff]   ;;  %v416_v61 = vrot.slane %v414_v60, 2  ;;  %v419_v63 = vrot.slane %v414_v60, 4 }
 0x10e   :  { %v418_v62 = vadd.f32 %v416_v61, %v414_v60 }
 0x10f   :  { %685 = vmatpush3.bf16.msra.mxu1 %v753_v53 }
 0x110   :  { %686 = vmatprep.subr.bf16.mxu1 %v842_v9  ;;  %v421_v2 = vadd.f32 %v419_v63, %v418_v62 }
 0x112   :  { %v422_v15 = vmax.f32 %v421_v2, 1e-16 }
 0x113   :  { %687 = vmatpush3.bf16.msra.mxu1 %v754_v54 }
 0x114   :  { %688 = vmatprep.subr.bf16.mxu1 %v842_v9  ;;  %760 = vrsqrt.f32 %v422_v15 }
 0x117   :  { %689 = vmatpush3.bf16.msra.mxu1 %v755_v55 }
 0x118   :  { %690 = vmatprep.subr.bf16.mxu1 %v842_v9 }
 0x11b   :  { %691 = vmatpush3.bf16.msra.mxu1 %v756_v56 }
 0x11c   :  { %692 = vmatprep.subr.bf16.mxu1 %v842_v9 }
 0x11f   :  { %693 = vmatpush3.bf16.msra.mxu1 %v757_v57 }
 0x120   :  { %694 = vmatprep.subr.bf16.mxu1 %v842_v9 }
 0x121   :  { %v761_v23 = vpop.eup %760 }
 0x123   :  { %695 = vmatpush3.bf16.msra.mxu1 %v758_v58 }
 0x124   :  { %696 = vmatprep.subr.bf16.mxu1 %v842_v9 }
 0x127   :  { %697 = vmatpush3.bf16.msra.mxu1 %v759_v59 }
 0x12a   :  { %699 = vmatmul.mubr.bf16.vlgmr.msra.gmra.mxu1 %v291_v51 }
 0x1ea   :  { %v398_v0 = vpop.f32.mrf.mxu1 }
 0x1eb   :  { %v404_v1 = vmul.f32 %v398_v0, %v398_v0  ;;  %v424_v19 = vmul.f32 %v398_v0, %v932_v11 }
 0x1ec   :  { %v700_v3 = vpop.f32.mrf.mxu1 }
 0x1ed   :  { %v406_v4 = vrot.slane %v404_v1, 2  ;;  %v409_v7 = vrot.slane %v404_v1, 4  ;;  %v426_v20 = vrot.slane %v424_v19, 2  ;;  %v429_v22 = vrot.slane %v424_v19, 4 }
 0x1ee   :  { %v401_v5 = vpop.f32.mrf.mxu1 }
 0x1ef   :  { %v408_v6 = vadd.f32 %v406_v4, %v404_v1  ;;  %v428_v21 = vadd.f32 %v426_v20, %v424_v19 }
 0x1f0   :  { %v701_v16 = vpop.f32.mrf.mxu1 }
 0x1f1   :  { %v411_v17 = vadd.f32 %v409_v7, %v408_v6  ;;  %v431_v24 = vadd.f32 %v429_v22, %v428_v21 }
 0x1f3   :  { %v412_v18 = vmax.f32 %v411_v17, 1e-24 }
 0x1f5   :  { %762 = vrsqrt.f32 %v412_v18 }
 0x202   :  { %v763_v25 = vpop.eup %762 }
 0x203   :  { %v432_v26 = vmul.f32 %v763_v25, %v431_v24 }
 0x205   :  { %v433_v27 = vmul.f32 %v761_v23, %v432_v26 }
 0x206   :  { %836 = dma.done.wait [#allocation5 + $0x2], 1024 }
 0x207   :  { %837 = vsyncadd [#allocation5 + $0x2], 4294966272  ;;  %702 = vmatprep.subr.bf16.mxu0 %v842_v9  ;;  %718 = vmatprep.mubr.msk.bf16.mxu0 %vm844_vm2, %v842_v9  ;;  %v764_v28 = vld [vmem:[#allocation4 + $0x38] sm:$0xff]   ;;  %v765_v29 = vld [vmem:[#allocation4 + $0x30] sm:$0xff]   ;;  %v554_v35 = vsub.f32 %v921_v8, %v927_v10  ;;  %vm557_vm3 = vcmask 1045504   ;;  %v565_v38 = vsel %vm287_vm0, %v433_v27, 0.0 }
 0x208   :  { %703 = vmatpush3.bf16.msra.mxu0 %v764_v28  ;;  %v766_v11 = vld [vmem:[#allocation4 + $0x28] sm:$0xff]   ;;  %v767_v30 = vld [vmem:[#allocation4 + $0x20] sm:$0xff]   ;;  %v768_v31 = vld [vmem:[#allocation4 + $0x18] sm:$0xff]   ;;  %v566_v40 = vrot.slane %v565_v38, 4  ;;  %vm581_vm4 = vcmask 1040384   ;;  %s845_s3 = smov [#allocation6]  }
 0x209   :  { %704 = vmatprep.subr.bf16.mxu0 %v842_v9  ;;  %v769_v32 = vld [vmem:[#allocation4 + $0x10] sm:$0xff]   ;;  %v770_v33 = vld [vmem:[#allocation4 + $0x8] sm:$0xff]   ;;  %v771_v34 = vld [vmem:[#allocation4] sm:$0xff]   ;;  %v556_v36 = vmul.f32 %v554_v35, %v554_v35  ;;  %s592_s4 = sshll.u32 %s845_s3, 4  ;;  %s593_s4 = int_to_ptr.vmem [resolvable:$true] %s592_s4 }
 0x20a   :  { %v567_v42 = vadd.f32 %v566_v40, %v565_v38  ;;  %v580_v62 = vld [vmem:[#allocation6] sm:$0x7]  ;;  %s812_s7 = scalar_lea.vmem %s593_s4, 64  ;;  %p817_p11 = scmp.lt.s32.totalorder %s593_s4, %s593_s4 }
 0x20b   :  { %v558_v37 = vsel %vm557_vm3, %v556_v36, 0.0  ;;  %p813_p10 = scmp.ne.s32.totalorder %s593_s4, %s812_s7  ;;  %p818_p12 = scmp.lt.s32.totalorder %s812_s7, %s812_s7 }
 0x20c   :  { %705 = vmatpush3.bf16.msra.mxu0 %v765_v29  ;;  %v559_v39 = vrot.slane %v558_v37, 4  ;;  %v568_v46 = vrot.slane %v567_v42, 2 }
 0x20d   :  { %706 = vmatprep.subr.bf16.mxu0 %v842_v9  ;;  %p819_p13 = por %p818_p12, %p817_p11 }
 0x20e   :  { %v560_v41 = vadd.f32 %v559_v39, %v558_v37  ;;  %v569_v51 = vadd.f32 %v568_v46, %v567_v42 }
 0x20f   :  { %p820_p0 = pnand %p819_p13, %p813_p10 }
 0x210   :  { %707 = vmatpush3.bf16.msra.mxu0 %v766_v11  ;;  %v570_v55 = vrot.slane %v569_v51, 1 }
 0x211   :  { %708 = vmatprep.subr.bf16.mxu0 %v842_v9 }
 0x212   :  { %v571_v58 = vadd.f32 %v570_v55, %v569_v51 }
 0x214   :  { %709 = vmatpush3.bf16.msra.mxu0 %v767_v30 }
 0x215   :  { %710 = vmatprep.subr.bf16.mxu0 %v842_v9 }
 0x218   :  { %711 = vmatpush3.bf16.msra.mxu0 %v768_v31 }
 0x219   :  { %712 = vmatprep.subr.bf16.mxu0 %v842_v9 }
 0x21c   :  { %713 = vmatpush3.bf16.msra.mxu0 %v769_v32 }
 0x21d   :  { %714 = vmatprep.subr.bf16.mxu0 %v842_v9 }
 0x220   :  { %715 = vmatpush3.bf16.msra.mxu0 %v770_v33 }
 0x221   :  { %716 = vmatprep.subr.bf16.mxu0 %v842_v9 }
 0x224   :  { %717 = vmatpush3.bf16.msra.mxu0 %v771_v34 }
 0x227   :  { %719 = vmatmul.mubr.bf16.vlgmr.msra.gmra.mxu0 %v936_v12  ;;  %v561_v12 = vrot.slane %v560_v41, 2 }
 0x229   :  { %v562_v49 = vadd.f32 %v561_v12, %v560_v41 }
 0x22b   :  { %v563_v54 = vrot.slane %v562_v49, 1 }
 0x2e7   :  { %v540_v43 = vpop.f32.mrf.mxu0 }
 0x2e8   :  { %v552_v44 = vmul.f32 %v946_v14, %v540_v43  ;;  %v564_v14 = vadd.f32 %v563_v54, %v562_v49 }
 0x2e9   :  { %v720_v9 = vpop.f32.mrf.mxu0 }
 0x2ea   :  { %v553_v45 = vsub.f32 %v552_v44, %v921_v8  ;;  %v582_v60 = vsel %vm581_vm4, %v564_v14, %v571_v58 }
 0x2eb   :  { %v543_v47 = vpop.f32.mrf.mxu0 }
 0x2ec   :  { %v555_v10 = vsub.f32 %v553_v45, %v941_v13 }
 0x2ed   :  { %v721_v48 = vpop.f32.mrf.mxu0 }
 0x2ee   :  { %v572_v50 = vmul.f32 %v555_v10, %v555_v10 }
 0x2f0   :  { %v573_v52 = vsel %vm557_vm3, %v572_v50, 0.0 }
 0x2f1   :  { %v574_v53 = vrot.slane %v573_v52, 4 }
 0x2f3   :  { %v575_v56 = vadd.f32 %v574_v53, %v573_v52 }
 0x2f5   :  { %v576_v57 = vrot.slane %v575_v56, 2 }
 0x2f7   :  { %v577_v59 = vadd.f32 %v576_v57, %v575_v56 }
 0x2f9   :  { %v578_v8 = vrot.slane %v577_v59, 1 }
 0x2fb   :  { %v579_v61 = vadd.f32 %v578_v8, %v577_v59 }
 0x2fd   :  { %v583_v13 = vsel %vm287_vm0, %v582_v60, %v579_v61 }
 0x2fe   :  { %v584_v63 = vadd.f32 %v583_v13, %v580_v62 }
 0x300   :  { %585 = vst [vmem:[#allocation6] sm:$0x7] %v584_v63 }
 0x301   :  { %823 = shalt.err (!%p820_p0)
}
 0x302   :  { %595 = dma.vmem_to_hbm [thread:$0]  %s593_s4, 64, %s997_s8, [#allocation7]  }
 0x303   :  { %838 = dma.done.wait [#allocation7], 64  }
 0x304   :  { %839 = vsyncadd [#allocation7], 4294967232 }
 0x305   :  { %599 = vsyncpa [#allocation7], 1 }
 0x306   :  { %600 = vsyncmov [#allocation5] }
 0x309   :  { %s601_s16 = vpop.sfrf %600 }
 0x30a   :  { %p661_p1 = scmp.ne.s32.totalorder %s601_s16, 0 }
 0x30c   :  { %605 = shalt.err (%p661_p1)  }
 0x30d   :  { %607 = vsyncmov [#allocation5 + $0x1] }
 0x310   :  { %s608_s17 = vpop.sfrf %607 }
 0x311   :  { %p662_p2 = scmp.ne.s32.totalorder %s608_s17, 0 }
 0x313   :  { %612 = shalt.err (%p662_p2)  }
 0x314   :  { %614 = vsyncmov [#allocation5 + $0x2] }
 0x317   :  { %s615_s18 = vpop.sfrf %614 }
 0x318   :  { %p663_p3 = scmp.ne.s32.totalorder %s615_s18, 0 }
 0x31a   :  { %619 = shalt.err (%p663_p3)  }

</bundles_post_ra>
